<compile_context>
chip_gen: v5e
topology: v5e:2x2
jax: 0.10.0
libtpu: 0.0.40
codegen_flags: <defaults>
</compile_context>

<pallas_src>
import jax
import jax.numpy as jnp
import numpy as np
from jax.experimental import pallas as pl
from jax.experimental.pallas import tpu as pltpu


def _cdiv(a, b):
    return -(-a // b)


def _round_up(a, m):
    return _cdiv(a, m) * m


def valid_tour_loss_reinforce(sum_log_probs, coords, tour, gt_tour, gt_len,
                              attn_matrix=None):
    B, T = tour.shape

    # ---- batch block size -------------------------------------------------
    # The dominant in-kernel intermediate is the (BB, T, T) f32 compare tensor
    # used for the unique-node count.  Budget it with (8, 128) layout padding
    # (per-row tile is ceil(T/8)*8 x ceil(T/128)*128 f32 words), keep a ~12 MiB
    # envelope for it (+ a same-sized temporary), well under the default
    # scoped-VMEM limit on v5e/v6e/v7x.
    # TODO(synk): for very large T (>~500 nodes) the (BB, T, T) compare no
    # longer fits even at BB=8; an id-chunked uniqueness loop would be needed.
    per_row_cmp = _round_up(T, 8) * _round_up(T, 128) * 4
    bb_vmem = max(8, ((12 << 20) // (2 * per_row_cmp)) // 8 * 8)
    BB = max(8, min(128, 8 * _cdiv(B, 8), bb_vmem))
    nb = _cdiv(B, BB)
    Bp = nb * BB
    pad = Bp - B

    xs = coords[..., 0].astype(jnp.float32)            # (B, T)
    ys = coords[..., 1].astype(jnp.float32)            # (B, T)
    slp = sum_log_probs.astype(jnp.float32).reshape(B, 1)
    gtl = gt_len.astype(jnp.float32).reshape(B, 1)
    tour_i = tour.astype(jnp.int32)
    gt_i = gt_tour.astype(jnp.int32)

    if pad:
        # Padded rows get slp = 0, so they contribute exactly 0 to the sum.
        xs = jnp.pad(xs, ((0, pad), (0, 0)))
        ys = jnp.pad(ys, ((0, pad), (0, 0)))
        slp = jnp.pad(slp, ((0, pad), (0, 0)))
        gtl = jnp.pad(gtl, ((0, pad), (0, 0)))
        tour_i = jnp.pad(tour_i, ((0, pad), (0, 0)))
        gt_i = jnp.pad(gt_i, ((0, pad), (0, 0)))

    # Node-id matrix, hoisted out of the kernel; ids2d[v, k] = v.  Resident
    # across the whole grid (constant index_map), so it is DMA'd once.
    ids2d = jnp.broadcast_to(jnp.arange(T, dtype=jnp.int32)[:, None], (T, T))

    def kernel(ids_ref, slp_ref, gtl_ref, xs_ref, ys_ref, tour_ref, gt_ref,
               out_ref):
        tour_blk = tour_ref[...]            # (BB, T) int32
        gt_blk = gt_ref[...]                # (BB, T) int32
        xs_blk = xs_ref[...]                # (BB, T) f32
        ys_blk = ys_ref[...]                # (BB, T) f32

        # unique-node count per row: node ids lie in [0, T) for a closed TSP
        # tour, so count which ids occur at least once.
        ids = ids_ref[...]                                           # (T, T)
        cmp = (tour_blk[:, None, :] == ids[None, :, :]).astype(jnp.float32)
        present = jnp.max(cmp, axis=-1)                              # (BB, T)
        unique = jnp.sum(present, axis=-1, keepdims=True)            # (BB, 1)
        valid = unique == jnp.float32(T - 1)

        # get_tour_len: sum of consecutive Euclidean distances (coords are
        # tour-ordered and the tour is closed, so this is the full length).
        dx = xs_blk[:, 1:] - xs_blk[:, :-1]
        dy = ys_blk[:, 1:] - ys_blk[:, :-1]
        tour_len = jnp.sum(jnp.sqrt(dx * dx + dy * dy),
                           axis=-1, keepdims=True)                   # (BB, 1)

        # invalid-tour reward: number of positions differing from gt_tour.
        mismatch = jnp.sum((tour_blk != gt_blk).astype(jnp.float32),
                           axis=-1, keepdims=True)                   # (BB, 1)

        reward = jnp.where(valid, tour_len - gtl_ref[...], mismatch)
        out_ref[...] = reward * slp_ref[...]

    per_row = pl.pallas_call(
        kernel,
        out_shape=jax.ShapeDtypeStruct((Bp, 1), jnp.float32),
        grid=(nb,),
        in_specs=[
            pl.BlockSpec((T, T), lambda i: (0, 0)),    # ids (resident)
            pl.BlockSpec((BB, 1), lambda i: (i, 0)),   # sum_log_probs
            pl.BlockSpec((BB, 1), lambda i: (i, 0)),   # gt_len
            pl.BlockSpec((BB, T), lambda i: (i, 0)),   # xs
            pl.BlockSpec((BB, T), lambda i: (i, 0)),   # ys
            pl.BlockSpec((BB, T), lambda i: (i, 0)),   # tour
            pl.BlockSpec((BB, T), lambda i: (i, 0)),   # gt_tour
        ],
        out_specs=pl.BlockSpec((BB, 1), lambda i: (i, 0)),
        compiler_params=pltpu.CompilerParams(
            dimension_semantics=("parallel",)),
    )(ids2d, slp, gtl, xs, ys, tour_i, gt_i)

    # torch.mean over the original batch; padded rows contribute exactly 0.
    return jnp.sum(per_row) / jnp.float32(B)


def _reference_loss(sum_log_probs, coords, tour, gt_tour, gt_len):
    """Pure-JAX vectorized reference with the same semantics."""
    B, T = tour.shape
    ids = jnp.arange(T, dtype=tour.dtype)
    present = jnp.any(tour[:, None, :] == ids[None, :, None], axis=-1)  # (B, T)
    unique = jnp.sum(present.astype(jnp.float32), axis=-1)
    valid = unique == jnp.float32(T - 1)
    diff = coords[:, 1:] - coords[:, :-1]
    tour_len = jnp.sum(jnp.sqrt(jnp.sum(diff * diff, axis=-1)), axis=-1)
    mismatch = jnp.sum((tour != gt_tour).astype(jnp.float32), axis=-1)
    rewards = jnp.where(valid, tour_len - gt_len, mismatch)
    return jnp.mean(rewards * sum_log_probs)


if __name__ == "__main__":
    key = jax.random.PRNGKey(0)
    B, N = 4, 8
    T = N + 1  # closed tour: return to start

    k_coords, k_tour, k_gt, k_slp = jax.random.split(key, 4)
    node_coords = jax.random.uniform(k_coords, (B, N, 2), dtype=jnp.float32)

    # Predicted tours: rows 0,1 valid permutations; rows 2,3 made invalid
    # by duplicating a node.
    perms = jnp.stack(
        [jax.random.permutation(jax.random.fold_in(k_tour, b), N) for b in range(B)])
    tour = jnp.concatenate([perms, perms[:, :1]], axis=1).astype(jnp.int32)
    tour = tour.at[2, 1].set(tour[2, 0])
    tour = tour.at[3, 2].set(tour[3, 0])

    gt_perms = jnp.stack(
        [jax.random.permutation(jax.random.fold_in(k_gt, b), N) for b in range(B)])
    gt_tour = jnp.concatenate([gt_perms, gt_perms[:, :1]], axis=1).astype(jnp.int32)

    # coords in predicted-tour order; gt_len from gt-tour-ordered coords.
    coords = jnp.take_along_axis(node_coords, tour[..., None], axis=1)       # (B, T, 2)
    gt_coords = jnp.take_along_axis(node_coords, gt_tour[..., None], axis=1)
    gt_diff = gt_coords[:, 1:] - gt_coords[:, :-1]
    gt_len = jnp.sum(jnp.sqrt(jnp.sum(gt_diff * gt_diff, axis=-1)), axis=-1)  # (B,)

    sum_log_probs = -jax.random.uniform(k_slp, (B,), dtype=jnp.float32) - 0.1
    attn_matrix = jnp.zeros((B, N, N), jnp.float32)  # unused by forward

    loss = valid_tour_loss_reinforce(sum_log_probs, coords, tour, gt_tour,
                                     gt_len, attn_matrix)
    loss = jax.block_until_ready(loss)

    ref = _reference_loss(sum_log_probs, coords, tour, gt_tour, gt_len)
    np.testing.assert_allclose(np.asarray(loss), np.asarray(ref),
                               rtol=1e-5, atol=1e-5)
    print("KERNEL_OK")
</pallas_src>

<mosaic_0001>
module attributes {stable_mosaic.version = 11 : i64} {
  func.func @kernel(%arg0: i32, %arg1: memref<9x9xi32, #tpu.memory_space<vmem>>, %arg2: memref<8x1xf32, #tpu.memory_space<vmem>>, %arg3: memref<8x1xf32, #tpu.memory_space<vmem>>, %arg4: memref<8x9xf32, #tpu.memory_space<vmem>>, %arg5: memref<8x9xf32, #tpu.memory_space<vmem>>, %arg6: memref<8x9xi32, #tpu.memory_space<vmem>>, %arg7: memref<8x9xi32, #tpu.memory_space<vmem>>, %arg8: memref<8x1xf32, #tpu.memory_space<vmem>>) attributes {dimension_semantics = [#tpu.dimension_semantics<parallel>], iteration_bounds = array<i64: 1>, scalar_prefetch = 0 : i64, scratch_operands = 0 : i64, tpu.core_type = #tpu.core_type<tc>, window_params = [{pipeline_mode = #tpu.pipeline_mode<synchronous>, transform_indices = @transform_0, window_bounds = array<i64: 9, 9>}, {transform_indices = @transform_1, window_bounds = array<i64: 8, 1>}, {transform_indices = @transform_2, window_bounds = array<i64: 8, 1>}, {transform_indices = @transform_3, window_bounds = array<i64: 8, 9>}, {transform_indices = @transform_4, window_bounds = array<i64: 8, 9>}, {transform_indices = @transform_5, window_bounds = array<i64: 8, 9>}, {transform_indices = @transform_6, window_bounds = array<i64: 8, 9>}, {transform_indices = @transform_7, window_bounds = array<i64: 8, 1>}]} {
    %c0 = arith.constant 0 : index
    %c0_0 = arith.constant 0 : index
    %0 = vector.load %arg6[%c0, %c0_0] : memref<8x9xi32, #tpu.memory_space<vmem>>, vector<8x9xi32>
    %c0_1 = arith.constant 0 : index
    %c0_2 = arith.constant 0 : index
    %1 = vector.load %arg7[%c0_1, %c0_2] : memref<8x9xi32, #tpu.memory_space<vmem>>, vector<8x9xi32>
    %c0_3 = arith.constant 0 : index
    %c0_4 = arith.constant 0 : index
    %2 = vector.load %arg4[%c0_3, %c0_4] : memref<8x9xf32, #tpu.memory_space<vmem>>, vector<8x9xf32>
    %c0_5 = arith.constant 0 : index
    %c0_6 = arith.constant 0 : index
    %3 = vector.load %arg5[%c0_5, %c0_6] : memref<8x9xf32, #tpu.memory_space<vmem>>, vector<8x9xf32>
    %c0_7 = arith.constant 0 : index
    %c0_8 = arith.constant 0 : index
    %4 = vector.load %arg1[%c0_7, %c0_8] : memref<9x9xi32, #tpu.memory_space<vmem>>, vector<9x9xi32>
    %5 = vector.shape_cast %0 : vector<8x9xi32> to vector<8x1x9xi32>
    %6 = vector.shape_cast %4 : vector<9x9xi32> to vector<1x9x9xi32>
    %7 = vector.broadcast %5 : vector<8x1x9xi32> to vector<8x9x9xi32>
    %8 = vector.broadcast %6 : vector<1x9x9xi32> to vector<8x9x9xi32>
    %9 = arith.cmpi eq, %7, %8 : vector<8x9x9xi32>
    %10 = arith.extui %9 : vector<8x9x9xi1> to vector<8x9x9xi32>
    %11 = arith.sitofp %10 : vector<8x9x9xi32> to vector<8x9x9xf32>
    %cst = arith.constant dense<0xFF800000> : vector<8x9xf32>
    %12 = vector.multi_reduction <maximumf>, %11, %cst [2] : vector<8x9x9xf32> to vector<8x9xf32>
    %cst_9 = arith.constant dense<0.000000e+00> : vector<8xf32>
    %13 = vector.multi_reduction <add>, %12, %cst_9 [1] : vector<8x9xf32> to vector<8xf32>
    %14 = vector.shape_cast %13 : vector<8xf32> to vector<8x1xf32>
    %cst_10 = arith.constant 8.000000e+00 : f32
    %15 = vector.broadcast %cst_10 : f32 to vector<8x1xf32>
    %16 = arith.cmpf oeq, %14, %15 : vector<8x1xf32>
    %17 = vector.extract_strided_slice %2 {offsets = [0, 1], sizes = [8, 8], strides = [1, 1]} : vector<8x9xf32> to vector<8x8xf32>
    %18 = vector.extract_strided_slice %2 {offsets = [0, 0], sizes = [8, 8], strides = [1, 1]} : vector<8x9xf32> to vector<8x8xf32>
    %19 = arith.subf %17, %18 : vector<8x8xf32>
    %20 = vector.extract_strided_slice %3 {offsets = [0, 1], sizes = [8, 8], strides = [1, 1]} : vector<8x9xf32> to vector<8x8xf32>
    %21 = vector.extract_strided_slice %3 {offsets = [0, 0], sizes = [8, 8], strides = [1, 1]} : vector<8x9xf32> to vector<8x8xf32>
    %22 = arith.subf %20, %21 : vector<8x8xf32>
    %23 = arith.mulf %19, %19 : vector<8x8xf32>
    %24 = arith.mulf %22, %22 : vector<8x8xf32>
    %25 = arith.addf %23, %24 : vector<8x8xf32>
    %26 = math.sqrt %25 : vector<8x8xf32>
    %cst_11 = arith.constant dense<0.000000e+00> : vector<8xf32>
    %27 = vector.multi_reduction <add>, %26, %cst_11 [1] : vector<8x8xf32> to vector<8xf32>
    %28 = vector.shape_cast %27 : vector<8xf32> to vector<8x1xf32>
    %29 = arith.cmpi ne, %0, %1 : vector<8x9xi32>
    %30 = arith.extui %29 : vector<8x9xi1> to vector<8x9xi32>
    %31 = arith.sitofp %30 : vector<8x9xi32> to vector<8x9xf32>
    %cst_12 = arith.constant dense<0.000000e+00> : vector<8xf32>
    %32 = vector.multi_reduction <add>, %31, %cst_12 [1] : vector<8x9xf32> to vector<8xf32>
    %33 = vector.shape_cast %32 : vector<8xf32> to vector<8x1xf32>
    %c0_13 = arith.constant 0 : index
    %c0_14 = arith.constant 0 : index
    %34 = vector.load %arg3[%c0_13, %c0_14] : memref<8x1xf32, #tpu.memory_space<vmem>>, vector<8x1xf32>
    %35 = arith.subf %28, %34 : vector<8x1xf32>
    %36 = arith.select %16, %35, %33 : vector<8x1xi1>, vector<8x1xf32>
    %c0_15 = arith.constant 0 : index
    %c0_16 = arith.constant 0 : index
    %37 = vector.load %arg2[%c0_15, %c0_16] : memref<8x1xf32, #tpu.memory_space<vmem>>, vector<8x1xf32>
    %38 = arith.mulf %36, %37 : vector<8x1xf32>
    %c0_17 = arith.constant 0 : index
    %c0_18 = arith.constant 0 : index
    %39 = vector.load %arg8[%c0_17, %c0_18] : memref<8x1xf32, #tpu.memory_space<vmem>>, vector<8x1xf32>
    tpu.vector_store %arg8[%c0_17, %c0_18], %38 {strides = array<i32>} : memref<8x1xf32, #tpu.memory_space<vmem>>, vector<8x1xf32>,
    return
  }
  func.func @transform_0(%arg0: i32) -> (i32, i32) {
    %c0_i32 = arith.constant 0 : i32
    %c0_i32_0 = arith.constant 0 : i32
    %c0_i32_1 = arith.constant 0 : i32
    return %c0_i32, %c0_i32_0 : i32, i32
  }
  func.func @transform_1(%arg0: i32) -> (i32, i32) {
    %c0_i32 = arith.constant 0 : i32
    %c0_i32_0 = arith.constant 0 : i32
    return %arg0, %c0_i32 : i32, i32
  }
  func.func @transform_2(%arg0: i32) -> (i32, i32) {
    %c0_i32 = arith.constant 0 : i32
    %c0_i32_0 = arith.constant 0 : i32
    return %arg0, %c0_i32 : i32, i32
  }
  func.func @transform_3(%arg0: i32) -> (i32, i32) {
    %c0_i32 = arith.constant 0 : i32
    %c0_i32_0 = arith.constant 0 : i32
    return %arg0, %c0_i32 : i32, i32
  }
  func.func @transform_4(%arg0: i32) -> (i32, i32) {
    %c0_i32 = arith.constant 0 : i32
    %c0_i32_0 = arith.constant 0 : i32
    return %arg0, %c0_i32 : i32, i32
  }
  func.func @transform_5(%arg0: i32) -> (i32, i32) {
    %c0_i32 = arith.constant 0 : i32
    %c0_i32_0 = arith.constant 0 : i32
    return %arg0, %c0_i32 : i32, i32
  }
  func.func @transform_6(%arg0: i32) -> (i32, i32) {
    %c0_i32 = arith.constant 0 : i32
    %c0_i32_0 = arith.constant 0 : i32
    return %arg0, %c0_i32 : i32, i32
  }
  func.func @transform_7(%arg0: i32) -> (i32, i32) {
    %c0_i32 = arith.constant 0 : i32
    %c0_i32_0 = arith.constant 0 : i32
    return %arg0, %c0_i32 : i32, i32
  }
}

</mosaic_0001>

<bundles_post_ra>
// kernel: tpu_custom_call.1
= control target key start
LH: loop header
LB: loop body
LE: loop exit
PB: predicated region body
PF: predicated region fallthrough
CT: control target
= control target key end

     0   :  { %12 = vsyncpa [#allocation3], 0  ;;  %s600_s0 = inlined_call_operand.vmem [shape: s32[9,9], index: 0, kind: input, shape index: {}]   ;;  %s601_s1 = inlined_call_operand.vmem [shape: f32[8,1], index: 1, kind: input, shape index: {}]   ;;  %s602_s2 = inlined_call_operand.vmem [shape: f32[8,1], index: 2, kind: input, shape index: {}]   ;;  %s603_s3 = inlined_call_operand.hbm [shape: f32[8,9], index: 3, kind: input, shape index: {}]   ;;  %s604_s4 = inlined_call_operand.hbm [shape: f32[8,9], index: 4, kind: input, shape index: {}]   ;;  %s605_s5 = inlined_call_operand.hbm [shape: s32[8,9], index: 5, kind: input, shape index: {}]   ;;  %s606_s6 = inlined_call_operand.hbm [shape: s32[8,9], index: 6, kind: input, shape index: {}]   ;;  %s607_s7 = inlined_call_operand.vmem [shape: f32[8,1], index: 7, kind: output, shape index: {}]  }
   0x1   :  { %13 = vsyncpa [#allocation5], 0  ;;  %s37_s26 = sshll.u32 %s604_s4, 4  ;;  %s38_s26 = int_to_ptr.hbm [resolvable:$true] %s37_s26 }
   0x2   :  { %14 = vsyncpa [#allocation8], 0  ;;  %s444_s27 = smov [#allocation4]   ;;  %s26_s8 = sshll.u32 %s603_s3, 4  ;;  %s27_s8 = int_to_ptr.hbm [resolvable:$true] %s26_s8 }
   0x3   :  { %s39_s28 = sshll.u32 %s444_s27, 4  ;;  %s445_s9 = smov [#allocation2]   ;;  %s40_s28 = int_to_ptr.vmem [resolvable:$true] %s39_s28 }
   0x4   :  { %42 = dma.hbm_to_vmem [thread:$0]  %s38_s26, 128, %s40_s28, [#allocation5]  }
   0x5   :  { %s28_s10 = sshll.u32 %s445_s9, 4  ;;  %s48_s13 = sshll.u32 %s605_s5, 4  ;;  %s29_s10 = int_to_ptr.vmem [resolvable:$true] %s28_s10  ;;  %s49_s13 = int_to_ptr.hbm [resolvable:$true] %s48_s13 }
   0x6   :  { %31 = dma.hbm_to_vmem [thread:$0]  %s27_s8, 128, %s29_s10, [#allocation3]  }
   0x7   :  { %s59_s15 = sshll.u32 %s606_s6, 4  ;;  %s446_s16 = smov [#allocation6]   ;;  %s60_s15 = int_to_ptr.hbm [resolvable:$true] %s59_s15 }
   0x8   :  { %s50_s17 = sshll.u32 %s446_s16, 4  ;;  %s447_s3 = smov [#allocation7]   ;;  %s51_s17 = int_to_ptr.vmem [resolvable:$true] %s50_s17 }
   0x9   :  { %53 = dma.hbm_to_vmem [thread:$0]  %s49_s13, 128, %s51_s17, [#allocation5]  }
   0xa   :  { %s61_s18 = sshll.u32 %s447_s3, 4  ;;  %s62_s18 = int_to_ptr.vmem [resolvable:$true] %s61_s18 }
   0xb   :  { %64 = dma.hbm_to_vmem [thread:$0]  %s60_s15, 128, %s62_s18, [#allocation8]  }
   0xc   :  { %438 = dma.done.wait [#allocation3], 128  }
   0xd   :  { %439 = vsyncadd [#allocation3], 4294967168 }
   0xe   :  { %440 = dma.done.wait [#allocation5], 256  }
   0xf   :  { %441 = vsyncadd [#allocation5], 4294967040 }
  0x10   :  { %442 = dma.done.wait [#allocation8], 128  }
  0x11   :  { %443 = vsyncadd [#allocation8], 4294967168  ;;  %v503_v0 = vld [vmem:[#allocation2] sm:$0xff]  ;;  %v505_v1 = vld [vmem:[#allocation6] sm:$0xff]  ;;  %s448_s5 = smov 1   ;;  %vm150_vm0 = vcmask 72704  }
  0x12   :  { %264 = vrot.lane.b32.xlu0 %v503_v0, %s448_s5  ;;  %v511_v2 = vld [vmem:[%s600_s0] sm:$0xff]  ;;  %v94_v3 = vperm.slane %v505_v1, 0  ;;  %v87_v4 = vrot.slane %v505_v1, 1  ;;  %v518_v5 = vld [vmem:[%s600_s0 + $0x8] sm:$0x1]  ;;  %v449_v7 = vmov 0.0  }
  0x13   :  { %v88_v10 = vrot.slane %v505_v1, 2  ;;  %v526_v11 = vld [vmem:[#allocation4] sm:$0xff]  ;;  %v89_v14 = vrot.slane %v505_v1, 3  ;;  %vm154_vm5 = vcmask 65536   ;;  %v90_v21 = vrot.slane %v505_v1, 4  ;;  %s450_s0 = smov 127  }
  0x14   :  { %vm102_vm1 = vcmp.eq.s32.totalorder %v94_v3, %v511_v2  ;;  %v95_v6 = vperm.slane %v87_v4, 0  ;;  %vm103_vm2 = vcmp.eq.s32.totalorder %v94_v3, %v518_v5  ;;  %v91_v27 = vrot.slane %v505_v1, 5 }
  0x15   :  { %v316_v8 = vsel %vm102_vm1, 1.0, %v449_v7  ;;  %v317_v15 = vsel %vm103_vm2, 1.0, %v449_v7  ;;  %v96_v16 = vperm.slane %v88_v10, 0  ;;  %v97_v19 = vperm.slane %v89_v14, 0 }
  0x16   :  { %v151_v9 = vsel %vm150_vm0, %v316_v8, -inf  ;;  %vm104_vm3 = vcmp.eq.s32.totalorder %v95_v6, %v511_v2  ;;  %vm105_vm4 = vcmp.eq.s32.totalorder %v95_v6, %v518_v5  ;;  %v155_v18 = vsel %vm154_vm5, %v317_v15, -inf }
  0x17   :  { %152 = vmax.xlane.f32.xlu1 %v151_v9  ;;  %v318_v12 = vsel %vm104_vm3, 1.0, %v449_v7  ;;  %v319_v17 = vsel %vm105_vm4, 1.0, %v449_v7  ;;  %vm107_vm6 = vcmp.eq.s32.totalorder %v96_v16, %v518_v5  ;;  %vm108_vm7 = vcmp.eq.s32.totalorder %v97_v19, %v511_v2 }
  0x18   :  { %v158_v13 = vsel %vm150_vm0, %v318_v12, -inf  ;;  %v161_v20 = vsel %vm154_vm5, %v319_v17, -inf  ;;  %v321_v22 = vsel %vm107_vm6, 1.0, %v449_v7  ;;  %v322_v23 = vsel %vm108_vm7, 1.0, %v449_v7 }
  0x19   :  { %159 = vmax.xlane.f32.xlu2 %v158_v13  ;;  %v167_v24 = vsel %vm154_vm5, %v321_v22, -inf  ;;  %v98_v25 = vperm.slane %v90_v21, 0  ;;  %vm109_vm8 = vcmp.eq.s32.totalorder %v97_v19, %v518_v5  ;;  %v170_v26 = vsel %vm150_vm0, %v322_v23, -inf }
  0x1a   :  { %269 = vrot.lane.b32.xlu0 %v526_v11, %s448_s5  ;;  %v323_v28 = vsel %vm109_vm8, 1.0, %v449_v7  ;;  %v99_v31 = vperm.slane %v91_v27, 0  ;;  %v92_v33 = vrot.slane %v505_v1, 6  ;;  %v93_v39 = vrot.slane %v505_v1, 7 }
  0x1b   :  { %vm110_vm9 = vcmp.eq.s32.totalorder %v98_v25, %v511_v2  ;;  %v173_v30 = vsel %vm154_vm5, %v323_v28, -inf  ;;  %vm111_vm10 = vcmp.eq.s32.totalorder %v98_v25, %v518_v5  ;;  %vm106_vm14 = vcmp.eq.s32.totalorder %v96_v16, %v511_v2 }
  0x1c   :  { %v324_v29 = vsel %vm110_vm9, 1.0, %v449_v7  ;;  %vm112_vm11 = vcmp.eq.s32.totalorder %v99_v31, %v511_v2  ;;  %v325_v34 = vsel %vm111_vm10, 1.0, %v449_v7  ;;  %v100_v37 = vperm.slane %v92_v33, 0 }
  0x1d   :  { %v176_v32 = vsel %vm150_vm0, %v324_v29, -inf  ;;  %v326_v35 = vsel %vm112_vm11, 1.0, %v449_v7  ;;  %v179_v36 = vsel %vm154_vm5, %v325_v34, -inf  ;;  %vm113_vm12 = vcmp.eq.s32.totalorder %v99_v31, %v518_v5 }
  0x1e   :  { %v182_v38 = vsel %vm150_vm0, %v326_v35, -inf  ;;  %vm114_vm13 = vcmp.eq.s32.totalorder %v100_v37, %v511_v2  ;;  %v327_v40 = vsel %vm113_vm12, 1.0, %v449_v7  ;;  %v101_v43 = vperm.slane %v93_v39, 0 }
  0x1f   :  { %156 = vmax.xlane.f32.xlu1 %v155_v18  ;;  %v328_v41 = vsel %vm114_vm13, 1.0, %v449_v7  ;;  %v185_v42 = vsel %vm154_vm5, %v327_v40, -inf  ;;  %vm115_vm15 = vcmp.eq.s32.totalorder %v100_v37, %v518_v5  ;;  %v320_v45 = vsel %vm106_vm14, 1.0, %v449_v7 }
  0x20   :  { %v188_v44 = vsel %vm150_vm0, %v328_v41, -inf  ;;  %vm116_vm1 = vcmp.eq.s32.totalorder %v101_v43, %v511_v2  ;;  %v329_v46 = vsel %vm115_vm15, 1.0, %v449_v7  ;;  %v164_v47 = vsel %vm150_vm0, %v320_v45, -inf }
  0x21   :  { %162 = vmax.xlane.f32.xlu2 %v161_v20  ;;  %v330_v48 = vsel %vm116_vm1, 1.0, %v449_v7  ;;  %v191_v49 = vsel %vm154_vm5, %v329_v46, -inf  ;;  %vm117_vm2 = vcmp.eq.s32.totalorder %v101_v43, %v518_v5  ;;  %v216_v14 = vlaneseq }
  0x22   :  { %v194_v50 = vsel %vm150_vm0, %v330_v48, -inf  ;;  %v331_v51 = vsel %vm117_vm2, 1.0, %v449_v7  ;;  %vm244_vm6 = vcmask 1041409   ;;  %vm246_vm7 = vcmask 1042434  }
  0x23   :  { %v197_v52 = vsel %vm154_vm5, %v331_v51, -inf  ;;  %v217_v17 = vand.u32 127, %v216_v14  ;;  %vm221_vm5 = vcmask 130112   ;;  %vm248_vm8 = vcmask 1043459  }
  0x24   :  { %vm250_vm9 = vcmask 1044484   ;;  %vm252_vm10 = vcmask 1045509   ;;  %vm254_vm11 = vcmask 1046534   ;;  %vm256_vm12 = vcmask 1047559  }
  0x25   :  { %v219_v20 = vadd.s32 4294967288, %v217_v17  ;;  %vm292_vm13 = vcmask 64512   ;;  %vm307_vm1 = vcmask 7168  }
  0x27   :  { %168 = vmax.xlane.f32.xlu1 %v167_v24 }
  0x29   :  { %171 = vmax.xlane.f32.xlu2 %v170_v26 }
  0x2f   :  { %174 = vmax.xlane.f32.xlu1 %v173_v30 }
  0x31   :  { %177 = vmax.xlane.f32.xlu2 %v176_v32 }
  0x37   :  { %180 = vmax.xlane.f32.xlu1 %v179_v36 }
  0x39   :  { %183 = vmax.xlane.f32.xlu2 %v182_v38 }
  0x3f   :  { %186 = vmax.xlane.f32.xlu1 %v185_v42 }
  0x41   :  { %189 = vmax.xlane.f32.xlu2 %v188_v44 }
  0x44   :  { %165 = vmax.xlane.f32.xlu0 %v164_v47 }
  0x47   :  { %192 = vmax.xlane.f32.xlu1 %v191_v49 }
  0x49   :  { %195 = vmax.xlane.f32.xlu2 %v194_v50 }
  0x4f   :  { %198 = vmax.xlane.f32.xlu1 %v197_v52 }
  0x84   :  { %v265_v53 = vpop.permute.xlu0 %264 }
  0x85   :  { %v267_v55 = vsub.f32 %v503_v0, %v265_v53 }
  0x87   :  { %v273_v59 = vmul.f32 %v267_v55, %v267_v55 }
  0x8a   :  { %v153_v54 = vpop.xlane.xlu1 %152 }
  0x8b   :  { %v218_v21 = vperm.slane %v153_v54, %v217_v17 }
  0x8c   :  { %v270_v56 = vpop.permute.xlu0 %269  ;;  %v160_v57 = vpop.xlane.xlu2 %159 }
  0x8d   :  { %v272_v58 = vsub.f32 %v526_v11, %v270_v56  ;;  %v223_v23 = vperm.slane %v160_v57, %v217_v17 }
  0x8f   :  { %v274_v60 = vmul.f32 %v272_v58, %v272_v58 }
  0x91   :  { %v275_v61 = vadd.f32 %v274_v60, %v273_v59  ;;  %v82_v59 = vld [vmem:[#allocation7] sm:$0xff] }
  0x92   :  { %v157_v62 = vpop.xlane.xlu1 %156  ;;  %vm296_vm14 = vcmp.ne.s32.totalorder %v505_v1, %v82_v59 }
  0x93   :  { %340 = vrsqrt.f32 %v275_v61  ;;  %vm283_vm3 = vcmp.eq.f32.partialorder %v275_v61, inf  ;;  %v286_v11 = vand.u32 2147483648, %v275_v61  ;;  %vm285_vm4 = vcmp.eq.f32.partialorder %v275_v61, 0.0 }
  0x94   :  { %v163_v63 = vpop.xlane.xlu2 %162  ;;  %v220_v22 = vperm.slane %v157_v62, %v219_v20  ;;  %v332_v62 = vsel %vm296_vm14, 1.0, %v449_v7 }
  0x95   :  { %v224_v24 = vperm.slane %v163_v63, %v219_v20  ;;  %v299_v63 = vsel %vm150_vm0, %v332_v62, 0.0 }
  0x96   :  { %v222_v27 = vsel %vm221_vm5, %v220_v22, %v218_v21 }
  0x97   :  { %v225_v28 = vsel %vm221_vm5, %v224_v24, %v223_v23 }
  0x98   :  { %v245_v35 = vsel %vm244_vm6, %v225_v28, %v222_v27 }
  0x99   :  { %v341_v2 = vpop.eup %340 }
  0x9a   :  { %v169_v3 = vpop.xlane.xlu1 %168  ;;  %v277_v4 = vmul.f32 %v341_v2, %v275_v61 }
  0x9b   :  { %v227_v31 = vperm.slane %v169_v3, %v219_v20  ;;  %v302_v3 = vld [vmem:[%s602_s2] sm:$0xff] }
  0x9c   :  { %v278_v5 = vmul.f32 %v341_v2, %v277_v4  ;;  %v172_v6 = vpop.xlane.xlu2 %171 }
  0x9d   :  { %v229_v30 = vperm.slane %v172_v6, %v217_v17  ;;  %v305_v6 = vld [vmem:[%s601_s1] sm:$0xff] }
  0x9e   :  { %v279_v8 = vmul.f32 0.5, %v278_v5 }
  0xa0   :  { %v280_v9 = vsub.f32 1.5, %v279_v8 }
  0xa2   :  { %v281_v10 = vmul.f32 %v341_v2, %v280_v9  ;;  %v175_v12 = vpop.xlane.xlu1 %174 }
  0xa3   :  { %v230_v29 = vperm.slane %v175_v12, %v219_v20 }
  0xa4   :  { %v282_v0 = vmul.f32 %v281_v10, %v275_v61  ;;  %v178_v13 = vpop.xlane.xlu2 %177 }
  0xa5   :  { %v232_v33 = vperm.slane %v178_v13, %v217_v17  ;;  %v231_v37 = vsel %vm221_vm5, %v230_v29, %v229_v30 }
  0xa6   :  { %v284_v15 = vsel %vm283_vm3, %v275_v61, %v282_v0 }
  0xa7   :  { %v287_v16 = vsel %vm285_vm4, %v286_v11, %v284_v15 }
  0xa8   :  { %289 = vrot.lane.b32.xlu2 %v287_v16, %s450_s0 }
  0xaa   :  { %v181_v18 = vpop.xlane.xlu1 %180 }
  0xab   :  { %v233_v32 = vperm.slane %v181_v18, %v219_v20 }
  0xac   :  { %v184_v19 = vpop.xlane.xlu2 %183 }
  0xad   :  { %v235_v39 = vperm.slane %v184_v19, %v217_v17  ;;  %v234_v40 = vsel %vm221_vm5, %v233_v32, %v232_v33 }
  0xb2   :  { %v187_v25 = vpop.xlane.xlu1 %186 }
  0xb3   :  { %v236_v38 = vperm.slane %v187_v25, %v219_v20 }
  0xb4   :  { %v190_v26 = vpop.xlane.xlu2 %189 }
  0xb5   :  { %v238_v45 = vperm.slane %v190_v26, %v217_v17  ;;  %v237_v47 = vsel %vm221_vm5, %v236_v38, %v235_v39 }
  0xb7   :  { %v166_v34 = vpop.xlane.xlu0 %165 }
  0xb8   :  { %v226_v36 = vperm.slane %v166_v34, %v217_v17 }
  0xba   :  { %v193_v41 = vpop.xlane.xlu1 %192  ;;  %v228_v42 = vsel %vm221_vm5, %v227_v31, %v226_v36 }
  0xbb   :  { %v247_v43 = vsel %vm246_vm7, %v228_v42, %v245_v35  ;;  %v239_v44 = vperm.slane %v193_v41, %v219_v20 }
  0xbc   :  { %v249_v46 = vsel %vm248_vm8, %v231_v37, %v247_v43  ;;  %v196_v49 = vpop.xlane.xlu2 %195 }
  0xbd   :  { %v251_v48 = vsel %vm250_vm9, %v234_v40, %v249_v46  ;;  %v240_v50 = vsel %vm221_vm5, %v239_v44, %v238_v45  ;;  %v241_v52 = vperm.slane %v196_v49, %v217_v17 }
  0xbe   :  { %v253_v51 = vsel %vm252_vm10, %v237_v47, %v251_v48 }
  0xbf   :  { %v255_v55 = vsel %vm254_vm11, %v240_v50, %v253_v51 }
  0xc2   :  { %v199_v53 = vpop.xlane.xlu1 %198 }
  0xc3   :  { %v242_v54 = vperm.slane %v199_v53, %v219_v20 }
  0xc5   :  { %v243_v56 = vsel %vm221_vm5, %v242_v54, %v241_v52 }
  0xc6   :  { %v257_v57 = vsel %vm256_vm12, %v243_v56, %v255_v55 }
  0xc7   :  { %v259_v58 = vsel %vm150_vm0, %v257_v57, 0.0 }
  0xc8   :  { %260 = vadd.xlane.f32.xlu1 %v259_v58 }
 0x102   :  { %v290_v60 = vpop.permute.xlu2 %289 }
 0x103   :  { %v293_v61 = vsel %vm292_vm13, %v290_v60, 0.0 }
 0x104   :  { %294 = vadd.xlane.f32.xlu0 %v293_v61 }
 0x10c   :  { %300 = vadd.xlane.f32.xlu0 %v299_v63 }
 0x13b   :  { %v261_v4 = vpop.xlane.xlu1 %260 }
 0x13c   :  { %vm262_vm15 = vcmp.eq.f32.partialorder %v261_v4, 8.0 }
 0x177   :  { %v295_v2 = vpop.xlane.xlu0 %294 }
 0x178   :  { %v303_v5 = vsub.f32 %v295_v2, %v302_v3 }
 0x17f   :  { %v301_v8 = vpop.xlane.xlu0 %300 }
 0x180   :  { %v304_v1 = vsel %vm262_vm15, %v303_v5, %v301_v8 }
 0x181   :  { %v306_v9 = vmul.f32 %v305_v6, %v304_v1 }
 0x183   :  { %308 = vst.msk [vmem:[%s607_s7] sm:$0xff] %vm307_vm1, %v306_v9 }
 0x184   :  { %313 = vsyncpa [#allocation3], 1 }
 0x185   :  { %314 = vsyncpa [#allocation5], 1 }
 0x186   :  { %315 = vsyncpa [#allocation8], 1 }

</bundles_post_ra>
